<compile_context>
chip_gen: v7x
topology: tpu7x:2x2x1
jax: 0.10.0
libtpu: 0.0.40
codegen_flags: <defaults>
</compile_context>

<pallas_src>
import functools

import jax
import jax.numpy as jnp
from jax.experimental import pallas as pl
from jax.experimental.pallas import tpu as pltpu


def _round_up(x, m):
    return ((x + m - 1) // m) * m


def _default_bf16_tanh():
    """bf16 tanh only where the VPU/EUP has a bf16 path (v6e / v7x)."""
    try:
        kind = jax.devices()[0].device_kind.lower()
    except Exception:
        return False
    return ("v6" in kind) or ("v7" in kind)


def _uniform_from_hash(seed_u32, gidx_u32):
    """Counter-based PRNG: splitmix32-style hash -> uniform [0, 1) float32."""
    x = gidx_u32 + seed_u32 * jnp.uint32(0x9E3779B9)
    x = (x ^ (x >> 16)) * jnp.uint32(0x7FEB352D)
    x = (x ^ (x >> 15)) * jnp.uint32(0x846CA68B)
    x = x ^ (x >> 16)
    return (x >> 8).astype(jnp.float32) * jnp.float32(1.0 / (1 << 24))


def _mcdp_kernel(seed_ref, xt_ref, w1_ref, b1_ref, w2_ref, b2_ref,
                 w3_ref, b3_ref, o_ref, *, dropout_p, use_bf16_tanh):
    f32, bf16 = jnp.float32, jnp.bfloat16

    # ---- MLP, transposed layout: activations are (features, batch_tile) ----
    xt = xt_ref[...].astype(f32)                                   # (D, TN)

    # Layer 1: K = n_dim. For n_dim == 1 it is a pure VPU outer product.
    if w1_ref.shape[1] == 1:
        pre1 = w1_ref[...] * xt + b1_ref[...]                      # (H, TN)
    else:
        pre1 = jnp.dot(w1_ref[...].astype(bf16), xt.astype(bf16),
                       preferred_element_type=f32) + b1_ref[...]

    # Fused tanh -> bf16: never keep the f32 activation live.
    if use_bf16_tanh:
        h1 = jnp.tanh(pre1.astype(bf16))                           # bf16 (H,TN)
    else:
        h1 = jnp.tanh(pre1).astype(bf16)

    # Layer 2: (H, H) @ (H, TN) on the MXU, bf16 operands, f32 accumulate.
    pre2 = jnp.dot(w2_ref[...], h1, preferred_element_type=f32) + b2_ref[...]
    if use_bf16_tanh:
        h2 = jnp.tanh(pre2.astype(bf16))
    else:
        h2 = jnp.tanh(pre2).astype(bf16)

    # Layer 3: (O, H) @ (H, TN) -> lane-dense (O, TN) output.
    out = jnp.dot(w3_ref[...], h2, preferred_element_type=f32) + b3_ref[...]

    # ---- nn.Dropout(p) in training mode (MC dropout) ----
    o_dim, tn = out.shape
    col = (jax.lax.broadcasted_iota(jnp.int32, (o_dim, tn), 1)
           + pl.program_id(0) * tn)
    row = jax.lax.broadcasted_iota(jnp.int32, (o_dim, tn), 0)
    # Absolute output index, independent of the tile size -> reproducible mask.
    gidx = col.astype(jnp.uint32) * jnp.uint32(o_dim) + row.astype(jnp.uint32)
    u = _uniform_from_hash(seed_ref[0].astype(jnp.uint32), gidx)
    keep = u >= jnp.float32(dropout_p)
    scale = jnp.float32(1.0 / (1.0 - dropout_p))
    o_ref[...] = jnp.where(keep, out * scale, 0.0).astype(o_ref.dtype)


def pack_params(params):
    """Hoisted, one-time weight packing (torch (out, in) layout -> kernel layout).

    Pads the hidden dim only up to a multiple of 8 (no-op for 200) and casts
    the MXU operands (w2, w3) to bf16 once, so repeated MC forward passes do
    not rebuild these on every call.
    """
    f32, bf16 = jnp.float32, jnp.bfloat16
    w1, b1 = params["w1"], params["b1"]
    w2, b2 = params["w2"], params["b2"]
    w3, b3 = params["w3"], params["b3"]
    h, d = w1.shape
    o = w3.shape[0]
    hp = _round_up(h, 8)                             # sublane alignment only

    w1p = jnp.zeros((hp, d), f32).at[:h, :].set(w1.astype(f32))
    b1p = jnp.zeros((hp, 1), f32).at[:h, 0].set(b1.astype(f32))
    w2p = jnp.zeros((hp, hp), f32).at[:h, :h].set(w2.astype(f32)).astype(bf16)
    b2p = jnp.zeros((hp, 1), f32).at[:h, 0].set(b2.astype(f32))
    w3p = jnp.zeros((o, hp), f32).at[:, :h].set(w3.astype(f32)).astype(bf16)
    b3p = b3.reshape(o, 1).astype(f32)
    return {"w1": w1p, "b1": b1p, "w2": w2p, "b2": b2p, "w3": w3p, "b3": b3p}


def mcdp_dnn_forward(x, packed, seed, dropout_p=0.5, block_n=2048,
                     use_bf16_tanh=None):
    """MCDP_DNN.forward: 2-hidden-layer Tanh MLP + output dropout (training).

    `packed` comes from pack_params(). A fresh `seed` (shape (1,), int32) must
    be supplied per MC forward pass (or use mcdp_dnn_mc_forward for batched
    MC sampling in a single launch).
    """
    n, d = x.shape
    w1, b1 = packed["w1"], packed["b1"]
    w2, b2 = packed["w2"], packed["b2"]
    w3, b3 = packed["w3"], packed["b3"]
    hp = w1.shape[0]
    o = w3.shape[0]
    f32 = jnp.float32

    if dropout_p >= 1.0:                             # guard: scale would be inf
        return jnp.zeros((n, o), f32)
    if use_bf16_tanh is None:
        use_bf16_tanh = _default_bf16_tanh()

    # --- batch tiling: big tiles to amortize per-step overhead, but keep >= 2
    #     grid steps (megacore / v7x) when the batch is large enough. ---
    n_pad128 = _round_up(max(n, 1), 128)
    tn = min(_round_up(block_n, 128), n_pad128)
    if n_pad128 >= 256:
        tn = min(tn, max(128, (n_pad128 // 2 // 128) * 128))
    n_pad = _round_up(n, tn)
    grid = (n_pad // tn,)

    xt = jnp.zeros((d, n_pad), f32).at[:, :n].set(x.T.astype(f32))

    kernel = functools.partial(_mcdp_kernel, dropout_p=dropout_p,
                               use_bf16_tanh=use_bf16_tanh)

    grid_spec = pltpu.PrefetchScalarGridSpec(
        num_scalar_prefetch=1,                       # seed lands in SMEM
        grid=grid,
        in_specs=[
            pl.BlockSpec((d, tn), lambda i, seed: (0, i)),     # x^T batch tile
            pl.BlockSpec((hp, d), lambda i, seed: (0, 0)),     # w1 (resident)
            pl.BlockSpec((hp, 1), lambda i, seed: (0, 0)),     # b1
            pl.BlockSpec((hp, hp), lambda i, seed: (0, 0)),    # w2 (bf16)
            pl.BlockSpec((hp, 1), lambda i, seed: (0, 0)),     # b2
            pl.BlockSpec((o, hp), lambda i, seed: (0, 0)),     # w3 (bf16)
            pl.BlockSpec((o, 1), lambda i, seed: (0, 0)),      # b3
        ],
        out_specs=pl.BlockSpec((o, tn), lambda i, seed: (0, i)),
    )

    flops = 2 * n_pad * hp * (d + hp + o)
    bytes_accessed = (4 * (d * n_pad + hp * d + 2 * hp + o + o * n_pad)
                      + 2 * (hp * hp + o * hp))
    cost = pl.CostEstimate(flops=flops, transcendentals=2 * n_pad * hp,
                           bytes_accessed=bytes_accessed)

    out_t = pl.pallas_call(
        kernel,
        out_shape=jax.ShapeDtypeStruct((o, n_pad), f32),
        grid_spec=grid_spec,
        compiler_params=pltpu.CompilerParams(
            dimension_semantics=("parallel",),
            vmem_limit_bytes=32 * 1024 * 1024),      # safe on v7x's 64 MiB too
        cost_estimate=cost,
    )(seed, xt, w1, b1, w2, b2, w3, b3)

    return out_t[:, :n].T                            # back to (batch, output)


def mcdp_dnn_mc_forward(x, packed, seed, mc_samples, dropout_p=0.5,
                        block_n=2048):
    """Run `mc_samples` MC-dropout forward passes in ONE pallas_call.

    Samples are stacked along the batch axis; each sample occupies distinct
    absolute column indices, so the counter-based hash gives every sample an
    independent dropout mask with a single launch (weights stay resident).
    Returns shape (mc_samples, batch, output_size).
    """
    n = x.shape[0]
    x_rep = jnp.tile(x, (mc_samples, 1))
    out = mcdp_dnn_forward(x_rep, packed, seed, dropout_p=dropout_p,
                           block_n=block_n)
    return out.reshape(mc_samples, n, -1)


def init_params(key, n_dim=1, num_hidden=200, output_size=1):
    """torch.nn.Linear-style init: U[-1/sqrt(fan_in), +], torch (out, in) layout."""
    ks = jax.random.split(key, 6)

    def lin(kw, kb, fan_in, fan_out):
        bound = fan_in ** -0.5
        w = jax.random.uniform(kw, (fan_out, fan_in), jnp.float32, -bound, bound)
        b = jax.random.uniform(kb, (fan_out,), jnp.float32, -bound, bound)
        return w, b

    w1, b1 = lin(ks[0], ks[1], n_dim, num_hidden)
    w2, b2 = lin(ks[2], ks[3], num_hidden, num_hidden)
    w3, b3 = lin(ks[4], ks[5], num_hidden, output_size)
    return {"w1": w1, "b1": b1, "w2": w2, "b2": b2, "w3": w3, "b3": b3}


def _reference_model(x, params):
    """Pure-JAX model(X) (no dropout), mirroring the kernel's bf16 MXU operands."""
    bf16 = jnp.bfloat16
    h1 = jnp.tanh(jnp.dot(x, params["w1"].T,
                          precision=jax.lax.Precision.HIGHEST) + params["b1"])
    h2 = jnp.tanh(jnp.dot(h1.astype(bf16), params["w2"].T.astype(bf16),
                          preferred_element_type=jnp.float32) + params["b2"])
    return (jnp.dot(h2.astype(bf16), params["w3"].T.astype(bf16),
                    preferred_element_type=jnp.float32) + params["b3"])


if __name__ == "__main__":
    key = jax.random.PRNGKey(0)
    k_param, k_x = jax.random.split(key)

    # Small shapes consistent with the module: X.reshape((-1, n_dim)), n_dim=1.
    N, N_DIM, HIDDEN, OUT = 8, 1, 200, 1
    params = init_params(k_param, n_dim=N_DIM, num_hidden=HIDDEN,
                         output_size=OUT)
    packed = pack_params(params)                    # hoisted out of hot path
    x = jax.random.normal(k_x, (N, N_DIM), dtype=jnp.float32)
    seed = jnp.array([42], dtype=jnp.int32)         # new seed per MC sample

    out = mcdp_dnn_forward(x, packed, seed, dropout_p=0.5)
    out = jax.block_until_ready(out)
    assert out.shape == (N, OUT) and out.dtype == jnp.float32

    # Sanity: with p=0.5 every output element is either 0 (dropped) or
    # 2 * model(x) (kept & rescaled), up to bf16 matmul/tanh rounding.
    scaled = 2.0 * _reference_model(x, params)
    err = jnp.minimum(jnp.abs(out), jnp.abs(out - scaled))
    assert bool(jnp.all(err <= 3e-2 + 3e-2 * jnp.abs(scaled))), "value check failed"

    # Batched MC sampling in a single launch.
    mc = mcdp_dnn_mc_forward(x, packed, seed, mc_samples=3, dropout_p=0.5)
    mc = jax.block_until_ready(mc)
    assert mc.shape == (3, N, OUT)
    mc_err = jnp.minimum(jnp.abs(mc), jnp.abs(mc - scaled[None]))
    assert bool(jnp.all(mc_err <= 3e-2 + 3e-2 * jnp.abs(scaled)[None]))

    # TODO(synk): torch's Philox dropout RNG stream is not bit-reproducible;
    # the mask here comes from a counter-based hash with identical statistics.
    print("KERNEL_OK")
</pallas_src>

<mosaic_0001>
module attributes {stable_mosaic.version = 11 : i64} {
  func.func @_mcdp_kernel(%arg0: i32, %arg1: memref<1xi32, #tpu.memory_space<smem>>, %arg2: memref<1x128xf32, #tpu.memory_space<vmem>>, %arg3: memref<200x1xf32, #tpu.memory_space<vmem>>, %arg4: memref<200x1xf32, #tpu.memory_space<vmem>>, %arg5: memref<200x200xbf16, #tpu.memory_space<vmem>>, %arg6: memref<200x1xf32, #tpu.memory_space<vmem>>, %arg7: memref<1x200xbf16, #tpu.memory_space<vmem>>, %arg8: memref<1x1xf32, #tpu.memory_space<vmem>>, %arg9: memref<1x128xf32, #tpu.memory_space<vmem>>) attributes {dimension_semantics = [#tpu.dimension_semantics<parallel>], iteration_bounds = array<i64: 1>, scalar_prefetch = 1 : i64, scratch_operands = 0 : i64, tpu.core_type = #tpu.core_type<tc>, window_params = [{transform_indices = @transform_0, window_bounds = array<i64: 1, 128>}, {pipeline_mode = #tpu.pipeline_mode<synchronous>, transform_indices = @transform_1, window_bounds = array<i64: 200, 1>}, {pipeline_mode = #tpu.pipeline_mode<synchronous>, transform_indices = @transform_2, window_bounds = array<i64: 200, 1>}, {pipeline_mode = #tpu.pipeline_mode<synchronous>, transform_indices = @transform_3, window_bounds = array<i64: 200, 200>}, {pipeline_mode = #tpu.pipeline_mode<synchronous>, transform_indices = @transform_4, window_bounds = array<i64: 200, 1>}, {pipeline_mode = #tpu.pipeline_mode<synchronous>, transform_indices = @transform_5, window_bounds = array<i64: 1, 200>}, {pipeline_mode = #tpu.pipeline_mode<synchronous>, transform_indices = @transform_6, window_bounds = array<i64: 1, 1>}, {transform_indices = @transform_7, window_bounds = array<i64: 1, 128>}]} {
    %c0 = arith.constant 0 : index
    %c0_0 = arith.constant 0 : index
    %0 = vector.load %arg2[%c0, %c0_0] : memref<1x128xf32, #tpu.memory_space<vmem>>, vector<1x128xf32>
    %c0_1 = arith.constant 0 : index
    %c0_2 = arith.constant 0 : index
    %1 = vector.load %arg3[%c0_1, %c0_2] : memref<200x1xf32, #tpu.memory_space<vmem>>, vector<200x1xf32>
    %2 = vector.broadcast %1 : vector<200x1xf32> to vector<200x128xf32>
    %3 = vector.broadcast %0 : vector<1x128xf32> to vector<200x128xf32>
    %4 = arith.mulf %2, %3 : vector<200x128xf32>
    %c0_3 = arith.constant 0 : index
    %c0_4 = arith.constant 0 : index
    %5 = vector.load %arg4[%c0_3, %c0_4] : memref<200x1xf32, #tpu.memory_space<vmem>>, vector<200x1xf32>
    %6 = vector.broadcast %5 : vector<200x1xf32> to vector<200x128xf32>
    %7 = arith.addf %4, %6 : vector<200x128xf32>
    %8 = math.tanh %7 : vector<200x128xf32>
    %9 = arith.truncf %8 : vector<200x128xf32> to vector<200x128xbf16>
    %c0_5 = arith.constant 0 : index
    %c0_6 = arith.constant 0 : index
    %10 = vector.load %arg5[%c0_5, %c0_6] : memref<200x200xbf16, #tpu.memory_space<vmem>>, vector<200x200xbf16>
    %cst = arith.constant dense<0.000000e+00> : vector<200x128xf32>
    %11 = tpu.matmul %10, %9, %cst {dimension_numbers = #tpu.dot_dimension_numbers<[1], [0], [0], [1], [0, 0, 1, 1], [], []>} : vector<200x200xbf16>, vector<200x128xbf16>, vector<200x128xf32> -> vector<200x128xf32>
    %c0_7 = arith.constant 0 : index
    %c0_8 = arith.constant 0 : index
    %12 = vector.load %arg6[%c0_7, %c0_8] : memref<200x1xf32, #tpu.memory_space<vmem>>, vector<200x1xf32>
    %13 = vector.broadcast %12 : vector<200x1xf32> to vector<200x128xf32>
    %14 = arith.addf %11, %13 : vector<200x128xf32>
    %15 = math.tanh %14 : vector<200x128xf32>
    %16 = arith.truncf %15 : vector<200x128xf32> to vector<200x128xbf16>
    %c0_9 = arith.constant 0 : index
    %c0_10 = arith.constant 0 : index
    %17 = vector.load %arg7[%c0_9, %c0_10] : memref<1x200xbf16, #tpu.memory_space<vmem>>, vector<1x200xbf16>
    %cst_11 = arith.constant dense<0.000000e+00> : vector<1x128xf32>
    %18 = tpu.matmul %17, %16, %cst_11 {dimension_numbers = #tpu.dot_dimension_numbers<[1], [0], [0], [1], [0, 0, 1, 1], [], []>} : vector<1x200xbf16>, vector<200x128xbf16>, vector<1x128xf32> -> vector<1x128xf32>
    %c0_12 = arith.constant 0 : index
    %c0_13 = arith.constant 0 : index
    %19 = vector.load %arg8[%c0_12, %c0_13] : memref<1x1xf32, #tpu.memory_space<vmem>>, vector<1x1xf32>
    %20 = vector.broadcast %19 : vector<1x1xf32> to vector<1x128xf32>
    %21 = arith.addf %18, %20 : vector<1x128xf32>
    %22 = tpu.iota {dimensions = array<i32: 1>} : vector<1x128xi32>
    %c128_i32 = arith.constant 128 : i32
    %23 = arith.muli %arg0, %c128_i32 : i32
    %24 = vector.broadcast %23 : i32 to vector<1x128xi32>
    %25 = arith.addi %22, %24 : vector<1x128xi32>
    %26 = tpu.iota {dimensions = array<i32: 0>} : vector<1x128xi32>
    %c1_i32 = arith.constant 1 : i32
    %27 = vector.broadcast %c1_i32 : i32 to vector<1x128xi32>
    %28 = arith.muli %25, %27 : vector<1x128xi32>
    %29 = arith.addi %28, %26 : vector<1x128xi32>
    %c0_14 = arith.constant 0 : index
    %30 = memref.load %arg1[%c0_14] : memref<1xi32, #tpu.memory_space<smem>>
    %c-1640531527_i32 = arith.constant -1640531527 : i32
    %31 = arith.muli %30, %c-1640531527_i32 : i32
    %32 = vector.broadcast %31 : i32 to vector<1x128xi32>
    %33 = arith.addi %29, %32 : vector<1x128xi32>
    %c16_i32 = arith.constant 16 : i32
    %34 = vector.broadcast %c16_i32 : i32 to vector<1x128xi32>
    %35 = arith.shrui %33, %34 : vector<1x128xi32>
    %36 = arith.xori %33, %35 : vector<1x128xi32>
    %c2146121005_i32 = arith.constant 2146121005 : i32
    %37 = vector.broadcast %c2146121005_i32 : i32 to vector<1x128xi32>
    %38 = arith.muli %36, %37 : vector<1x128xi32>
    %c15_i32 = arith.constant 15 : i32
    %39 = vector.broadcast %c15_i32 : i32 to vector<1x128xi32>
    %40 = arith.shrui %38, %39 : vector<1x128xi32>
    %41 = arith.xori %38, %40 : vector<1x128xi32>
    %c-2073254261_i32 = arith.constant -2073254261 : i32
    %42 = vector.broadcast %c-2073254261_i32 : i32 to vector<1x128xi32>
    %43 = arith.muli %41, %42 : vector<1x128xi32>
    %c16_i32_15 = arith.constant 16 : i32
    %44 = vector.broadcast %c16_i32_15 : i32 to vector<1x128xi32>
    %45 = arith.shrui %43, %44 : vector<1x128xi32>
    %46 = arith.xori %43, %45 : vector<1x128xi32>
    %c8_i32 = arith.constant 8 : i32
    %47 = vector.broadcast %c8_i32 : i32 to vector<1x128xi32>
    %48 = arith.shrui %46, %47 : vector<1x128xi32>
    %49 = arith.uitofp %48 : vector<1x128xi32> to vector<1x128xf32>
    %cst_16 = arith.constant 5.96046448E-8 : f32
    %50 = vector.broadcast %cst_16 : f32 to vector<1x128xf32>
    %51 = arith.mulf %49, %50 : vector<1x128xf32>
    %cst_17 = arith.constant 5.000000e-01 : f32
    %52 = vector.broadcast %cst_17 : f32 to vector<1x128xf32>
    %53 = arith.cmpf oge, %51, %52 : vector<1x128xf32>
    %cst_18 = arith.constant 2.000000e+00 : f32
    %54 = vector.broadcast %cst_18 : f32 to vector<1x128xf32>
    %55 = arith.mulf %21, %54 : vector<1x128xf32>
    %cst_19 = arith.constant 0.000000e+00 : f32
    %56 = vector.broadcast %cst_19 : f32 to vector<1x128xf32>
    %57 = arith.select %53, %55, %56 : vector<1x128xi1>, vector<1x128xf32>
    %c0_20 = arith.constant 0 : index
    %c0_21 = arith.constant 0 : index
    %58 = vector.load %arg9[%c0_20, %c0_21] : memref<1x128xf32, #tpu.memory_space<vmem>>, vector<1x128xf32>
    tpu.vector_store %arg9[%c0_20, %c0_21], %57 {strides = array<i32>} : memref<1x128xf32, #tpu.memory_space<vmem>>, vector<1x128xf32>,
    return
  }
  func.func @transform_0(%arg0: i32, %arg1: memref<1xi32, #tpu.memory_space<smem>>) -> (i32, i32) {
    %c0_i32 = arith.constant 0 : i32
    %c0_i32_0 = arith.constant 0 : i32
    return %c0_i32, %arg0 : i32, i32
  }
  func.func @transform_1(%arg0: i32, %arg1: memref<1xi32, #tpu.memory_space<smem>>) -> (i32, i32) {
    %c0_i32 = arith.constant 0 : i32
    %c0_i32_0 = arith.constant 0 : i32
    %c0_i32_1 = arith.constant 0 : i32
    return %c0_i32, %c0_i32_0 : i32, i32
  }
  func.func @transform_2(%arg0: i32, %arg1: memref<1xi32, #tpu.memory_space<smem>>) -> (i32, i32) {
    %c0_i32 = arith.constant 0 : i32
    %c0_i32_0 = arith.constant 0 : i32
    %c0_i32_1 = arith.constant 0 : i32
    return %c0_i32, %c0_i32_0 : i32, i32
  }
  func.func @transform_3(%arg0: i32, %arg1: memref<1xi32, #tpu.memory_space<smem>>) -> (i32, i32) {
    %c0_i32 = arith.constant 0 : i32
    %c0_i32_0 = arith.constant 0 : i32
    %c0_i32_1 = arith.constant 0 : i32
    return %c0_i32, %c0_i32_0 : i32, i32
  }
  func.func @transform_4(%arg0: i32, %arg1: memref<1xi32, #tpu.memory_space<smem>>) -> (i32, i32) {
    %c0_i32 = arith.constant 0 : i32
    %c0_i32_0 = arith.constant 0 : i32
    %c0_i32_1 = arith.constant 0 : i32
    return %c0_i32, %c0_i32_0 : i32, i32
  }
  func.func @transform_5(%arg0: i32, %arg1: memref<1xi32, #tpu.memory_space<smem>>) -> (i32, i32) {
    %c0_i32 = arith.constant 0 : i32
    %c0_i32_0 = arith.constant 0 : i32
    %c0_i32_1 = arith.constant 0 : i32
    return %c0_i32, %c0_i32_0 : i32, i32
  }
  func.func @transform_6(%arg0: i32, %arg1: memref<1xi32, #tpu.memory_space<smem>>) -> (i32, i32) {
    %c0_i32 = arith.constant 0 : i32
    %c0_i32_0 = arith.constant 0 : i32
    %c0_i32_1 = arith.constant 0 : i32
    return %c0_i32, %c0_i32_0 : i32, i32
  }
  func.func @transform_7(%arg0: i32, %arg1: memref<1xi32, #tpu.memory_space<smem>>) -> (i32, i32) {
    %c0_i32 = arith.constant 0 : i32
    %c0_i32_0 = arith.constant 0 : i32
    return %c0_i32, %arg0 : i32, i32
  }
}

</mosaic_0001>

<bundles_post_ra>
// kernel: tpu_custom_call.1
= control target key start
LH: loop header
LB: loop body
LE: loop exit
PB: predicated region body
PF: predicated region fallthrough
CT: control target
= control target key end

     0   :  { %s1732_s0 = inlined_call_operand.<no memory space> [shape: s32[1], index: 0, kind: input, shape index: {}]   ;;  %s1733_s1 = inlined_call_operand.vmem [shape: f32[1,128], index: 1, kind: input, shape index: {}]   ;;  %s1734_s2 = inlined_call_operand.vmem [shape: f32[200,1], index: 2, kind: input, shape index: {}]   ;;  %s1735_s3 = inlined_call_operand.vmem [shape: f32[200,1], index: 3, kind: input, shape index: {}]   ;;  %s1736_s4 = inlined_call_operand.vmem [shape: bf16[200,200], index: 4, kind: input, shape index: {}]   ;;  %s1737_s5 = inlined_call_operand.vmem [shape: f32[200,1], index: 5, kind: input, shape index: {}]   ;;  %s1738_s6 = inlined_call_operand.vmem [shape: bf16[1,200], index: 6, kind: input, shape index: {}]   ;;  %s1739_s7 = inlined_call_operand.<no memory space> [shape: f32[1,1], index: 7, kind: input, shape index: {}]   ;;  %s1740_s8 = inlined_call_operand.hbm [shape: f32[1,128], index: 8, kind: output, shape index: {}]  }
   0x1   :  { %v14_v0 = vstv %s1739_s7 }
   0x2   :  { %15 = vst [vmem:[#allocation4] sm:$0x1] %v14_v0 }
   0x3   :  { %v214_v1 = vld [vmem:[%s1735_s3] sm:$0xff]  ;;  %v1270_v3 = vmov 0   ;;  %v215_v4 = vld [vmem:[%s1735_s3 + $0x8] sm:$0xff]  ;;  %v36_v6 = vld [vmem:[%s1734_s2 + $0x18] sm:$0xff] }
   0x4   :  { %v33_v2 = vld [vmem:[%s1734_s2] sm:$0xff]  ;;  %1107 = vset.pattern.permute.xlu1 %v1270_v3  ;;  %1106 = vset.pattern.permute.xlu0 %v1270_v3  ;;  %v34_v5 = vld [vmem:[%s1734_s2 + $0x8] sm:$0xff]  ;;  %v35_v7 = vld [vmem:[%s1734_s2 + $0x10] sm:$0xff] }
   0x5   :  { %241 = vperm.xlu1 %1107, %v214_v1   ;;  %60 = vperm.xlu0 %1106, %v33_v2   ;;  %v217_v8 = vld [vmem:[%s1735_s3 + $0x18] sm:$0xff]  ;;  %v216_v9 = vld [vmem:[%s1735_s3 + $0x10] sm:$0xff]  ;;  %v38_v10 = vld [vmem:[%s1734_s2 + $0x28] sm:$0xff] }
   0x6   :  { %760 = vmatprep.subr.bf16.mxu0 %v1270_v3  ;;  %975 = vmatprep.subr.bf16.mxu1 %v1270_v3  ;;  %v37_v11 = vld [vmem:[%s1734_s2 + $0x20] sm:$0xff]  ;;  %v219_v12 = vld [vmem:[%s1735_s3 + $0x28] sm:$0xff]  ;;  %v40_v14 = vld [vmem:[%s1734_s2 + $0x38] sm:$0xff] }
   0x7   :  { %v218_v13 = vld [vmem:[%s1735_s3 + $0x20] sm:$0xff]  ;;  %v39_v15 = vld [vmem:[%s1734_s2 + $0x30] sm:$0xff]  ;;  %v221_v16 = vld [vmem:[%s1735_s3 + $0x38] sm:$0xff] }
   0x8   :  { %v220_v17 = vld [vmem:[%s1735_s3 + $0x30] sm:$0xff]  ;;  %v42_v18 = vld [vmem:[%s1734_s2 + $0x48] sm:$0xff]  ;;  %v41_v19 = vld [vmem:[%s1734_s2 + $0x40] sm:$0xff] }
   0x9   :  { %246 = vperm.xlu1 %1107, %v215_v4   ;;  %65 = vperm.xlu0 %1106, %v34_v5  }
   0xd   :  { %75 = vperm.xlu1 %1107, %v36_v6   ;;  %70 = vperm.xlu0 %1106, %v35_v7  }
  0x11   :  { %256 = vperm.xlu1 %1107, %v217_v8   ;;  %251 = vperm.xlu0 %1106, %v216_v9  }
  0x15   :  { %85 = vperm.xlu1 %1107, %v38_v10   ;;  %80 = vperm.xlu0 %1106, %v37_v11  }
  0x19   :  { %266 = vperm.xlu1 %1107, %v219_v12   ;;  %261 = vperm.xlu0 %1106, %v218_v13  }
  0x1d   :  { %95 = vperm.xlu1 %1107, %v40_v14   ;;  %90 = vperm.xlu0 %1106, %v39_v15  }
  0x21   :  { %276 = vperm.xlu1 %1107, %v221_v16   ;;  %271 = vperm.xlu0 %1106, %v220_v17  }
  0x22   :  { %16 = vsyncpa [#allocation6], 0  ;;  %v223_v20 = vld [vmem:[%s1735_s3 + $0x48] sm:$0xff]  ;;  %v222_v21 = vld [vmem:[%s1735_s3 + $0x40] sm:$0xff]  ;;  %vm716_vm0 = vcmask 588800   ;;  %vm756_vm1 = vcmask 1043456  }
  0x23   :  { %v44_v22 = vld [vmem:[%s1734_s2 + $0x58] sm:$0xff]  ;;  %v43_v23 = vld [vmem:[%s1734_s2 + $0x50] sm:$0xff]  ;;  %v46_v26 = vld [vmem:[%s1734_s2 + $0x68] sm:$0xff]  ;;  %s1024_s13 = smul.u32 2654435769, %s1732_s0  ;;  %s1272_s0 = smov [#allocation5]  }
  0x24   :  { %v225_v24 = vld [vmem:[%s1735_s3 + $0x58] sm:$0xff]  ;;  %v224_v25 = vld [vmem:[%s1735_s3 + $0x50] sm:$0xff]  ;;  %v45_v27 = vld [vmem:[%s1734_s2 + $0x60] sm:$0xff]  ;;  %s1053_s14 = sshll.u32 %s1272_s0, 4  ;;  %s1054_s14 = int_to_ptr.vmem [resolvable:$true] %s1053_s14 }
  0x25   :  { %105 = vperm.xlu1 %1107, %v42_v18   ;;  %100 = vperm.xlu0 %1106, %v41_v19   ;;  %v227_v28 = vld [vmem:[%s1735_s3 + $0x68] sm:$0xff]  ;;  %v226_v29 = vld [vmem:[%s1735_s3 + $0x60] sm:$0xff]  ;;  %v48_v30 = vld [vmem:[%s1734_s2 + $0x78] sm:$0xff]  ;;  %s1246_s15 = scalar_lea.vmem %s1054_s14, 16  ;;  %s1250_s16 = scalar_lea.vmem %s1054_s14, 32 }
  0x26   :  { %v47_v31 = vld [vmem:[%s1734_s2 + $0x70] sm:$0xff]  ;;  %v229_v32 = vld [vmem:[%s1735_s3 + $0x78] sm:$0xff]  ;;  %v50_v34 = vld [vmem:[%s1734_s2 + $0x88] sm:$0xff]  ;;  %p1247_p0 = scmp.ne.s32.totalorder %s1054_s14, %s1246_s15  ;;  %p1251_p1 = scmp.lt.s32.totalorder %s1054_s14, %s1054_s14 }
  0x27   :  { %v228_v33 = vld [vmem:[%s1735_s3 + $0x70] sm:$0xff]  ;;  %v49_v35 = vld [vmem:[%s1734_s2 + $0x80] sm:$0xff]  ;;  %v231_v36 = vld [vmem:[%s1735_s3 + $0x88] sm:$0xff]  ;;  %p1252_p2 = scmp.lt.s32.totalorder %s1250_s16, %s1246_s15 }
  0x28   :  { %v230_v37 = vld [vmem:[%s1735_s3 + $0x80] sm:$0xff]  ;;  %v52_v38 = vld [vmem:[%s1734_s2 + $0x98] sm:$0xff]  ;;  %v51_v39 = vld [vmem:[%s1734_s2 + $0x90] sm:$0xff] }
  0x29   :  { %286 = vperm.xlu1 %1107, %v223_v20   ;;  %281 = vperm.xlu0 %1106, %v222_v21   ;;  %v233_v40 = vld [vmem:[%s1735_s3 + $0x98] sm:$0xff]  ;;  %v232_v41 = vld [vmem:[%s1735_s3 + $0x90] sm:$0xff]  ;;  %v54_v42 = vld [vmem:[%s1734_s2 + $0xa8] sm:$0xff]  ;;  %p1253_p3 = por %p1252_p2, %p1251_p1 }
  0x2a   :  { %v53_v43 = vld [vmem:[%s1734_s2 + $0xa0] sm:$0xff]  ;;  %v235_v44 = vld [vmem:[%s1735_s3 + $0xa8] sm:$0xff]  ;;  %v56_v46 = vld [vmem:[%s1734_s2 + $0xb8] sm:$0xff] }
  0x2b   :  { %v234_v45 = vld [vmem:[%s1735_s3 + $0xa0] sm:$0xff]  ;;  %v55_v47 = vld [vmem:[%s1734_s2 + $0xb0] sm:$0xff]  ;;  %v237_v48 = vld [vmem:[%s1735_s3 + $0xb8] sm:$0xff]  ;;  %p1254_p4 = pnand %p1253_p3, %p1247_p0 }
  0x2c   :  { %v236_v49 = vld [vmem:[%s1735_s3 + $0xb0] sm:$0xff]  ;;  %v238_v50 = vld [vmem:[%s1735_s3 + $0xc0] sm:$0xff]  ;;  %v453_v52 = vld [vmem:[%s1737_s5 + $0x8] sm:$0xff] }
  0x2d   :  { %115 = vperm.xlu1 %1107, %v44_v22   ;;  %110 = vperm.xlu0 %1106, %v43_v23   ;;  %v57_v51 = vld [vmem:[%s1734_s2 + $0xc0] sm:$0xff]  ;;  %v455_v54 = vld [vmem:[%s1737_s5 + $0x18] sm:$0xff]  ;;  %v454_v55 = vld [vmem:[%s1737_s5 + $0x10] sm:$0xff] }
  0x2e   :  { %v452_v53 = vld [vmem:[%s1737_s5] sm:$0xff]  ;;  %v457_v56 = vld [vmem:[%s1737_s5 + $0x28] sm:$0xff]  ;;  %v459_v58 = vld [vmem:[%s1737_s5 + $0x38] sm:$0xff] }
  0x2f   :  { %v456_v57 = vld [vmem:[%s1737_s5 + $0x20] sm:$0xff]  ;;  %v458_v59 = vld [vmem:[%s1737_s5 + $0x30] sm:$0xff]  ;;  %v461_v60 = vld [vmem:[%s1737_s5 + $0x48] sm:$0xff] }
  0x30   :  { %v460_v61 = vld [vmem:[%s1737_s5 + $0x40] sm:$0xff]  ;;  %v463_v63 = vld [vmem:[%s1737_s5 + $0x58] sm:$0xff]  ;;  %v462_v0 = vld [vmem:[%s1737_s5 + $0x50] sm:$0xff] }
  0x31   :  { %296 = vperm.xlu1 %1107, %v225_v24   ;;  %291 = vperm.xlu0 %1106, %v224_v25   ;;  %v1110_v62 = vld [vmem:[%s1736_s4 + $0x4] ss:$8 sps:$4 sm:$0xff]   ;;  %v1524_v4 = vld [vmem:[%s1733_s1] ss:$0 sm:$0xff]  ;;  %v467_v5 = vld [vmem:[%s1737_s5 + $0x78] sm:$0xff] }
  0x32   :  { %1088 = vmatprep.mubr.msk.bf16.mxu0 %vm716_vm0, %v1110_v62  ;;  %v465_v1 = vld [vmem:[%s1737_s5 + $0x68] sm:$0xff]  ;;  %v464_v2 = vld [vmem:[%s1737_s5 + $0x60] sm:$0xff]  ;;  %v466_v6 = vld [vmem:[%s1737_s5 + $0x70] sm:$0xff] }
  0x33   :  { %v469_v10 = vld [vmem:[%s1737_s5 + $0x88] sm:$0xff]  ;;  %v468_v11 = vld [vmem:[%s1737_s5 + $0x80] sm:$0xff]  ;;  %v471_v16 = vld [vmem:[%s1737_s5 + $0x98] sm:$0xff] }
  0x34   :  { %v470_v17 = vld [vmem:[%s1737_s5 + $0x90] sm:$0xff]  ;;  %v473_v21 = vld [vmem:[%s1737_s5 + $0xa8] sm:$0xff]  ;;  %v472_v22 = vld [vmem:[%s1737_s5 + $0xa0] sm:$0xff] }
  0x35   :  { %125 = vperm.xlu1 %1107, %v46_v26   ;;  %120 = vperm.xlu0 %1106, %v45_v27  }
  0x39   :  { %306 = vperm.xlu1 %1107, %v227_v28   ;;  %301 = vperm.xlu0 %1106, %v226_v29   ;;  %v475_v29 = vld [vmem:[%s1737_s5 + $0xb8] sm:$0xff] }
  0x3d   :  { %135 = vperm.xlu1 %1107, %v48_v30   ;;  %130 = vperm.xlu0 %1106, %v47_v31   ;;  %v474_v30 = vld [vmem:[%s1737_s5 + $0xb0] sm:$0xff] }
  0x41   :  { %316 = vperm.xlu1 %1107, %v229_v32   ;;  %311 = vperm.xlu0 %1106, %v228_v33  }
  0x45   :  { %145 = vperm.xlu1 %1107, %v50_v34   ;;  %140 = vperm.xlu0 %1106, %v49_v35   ;;  %v935_v34 = vld [vmem:[#allocation4] sm:$0x1] }
  0x46   :  { %v476_v35 = vld [vmem:[%s1737_s5 + $0xc0] sm:$0xff] }
  0x49   :  { %326 = vperm.xlu1 %1107, %v231_v36   ;;  %321 = vperm.xlu0 %1106, %v230_v37  }
  0x4d   :  { %155 = vperm.xlu1 %1107, %v52_v38   ;;  %150 = vperm.xlu0 %1106, %v51_v39  }
  0x51   :  { %336 = vperm.xlu1 %1107, %v233_v40   ;;  %331 = vperm.xlu0 %1106, %v232_v41  }
  0x55   :  { %165 = vperm.xlu1 %1107, %v54_v42   ;;  %160 = vperm.xlu0 %1106, %v53_v43  }
  0x59   :  { %346 = vperm.xlu1 %1107, %v235_v44   ;;  %341 = vperm.xlu0 %1106, %v234_v45  }
  0x5d   :  { %175 = vperm.xlu1 %1107, %v56_v46   ;;  %170 = vperm.xlu0 %1106, %v55_v47  }
  0x61   :  { %356 = vperm.xlu1 %1107, %v237_v48   ;;  %351 = vperm.xlu0 %1106, %v236_v49  }
  0x65   :  { %361 = vperm.xlu1 %1107, %v238_v50   ;;  %180 = vperm.xlu0 %1106, %v57_v51  }
  0x69   :  { %484 = vperm.xlu1 %1107, %v453_v52   ;;  %479 = vperm.xlu0 %1106, %v452_v53  }
  0x6d   :  { %494 = vperm.xlu1 %1107, %v455_v54   ;;  %489 = vperm.xlu0 %1106, %v454_v55  }
  0x71   :  { %504 = vperm.xlu1 %1107, %v457_v56   ;;  %499 = vperm.xlu0 %1106, %v456_v57  }
  0x75   :  { %514 = vperm.xlu1 %1107, %v459_v58   ;;  %509 = vperm.xlu0 %1106, %v458_v59  }
  0x79   :  { %524 = vperm.xlu1 %1107, %v461_v60   ;;  %519 = vperm.xlu0 %1106, %v460_v61  }
  0x7d   :  { %534 = vperm.xlu1 %1107, %v463_v63   ;;  %529 = vperm.xlu0 %1106, %v462_v0  }
  0x81   :  { %544 = vperm.xlu1 %1107, %v465_v1   ;;  %539 = vperm.xlu0 %1106, %v464_v2  }
  0x84   :  { %v242_v7 = vpop.permute.xlu1 %241  ;;  %v61_v8 = vpop.permute.xlu0 %60 }
  0x85   :  { %v189_v9 = vmul.f32 %v1524_v4, %v61_v8  ;;  %554 = vperm.xlu1 %1107, %v467_v5   ;;  %549 = vperm.xlu0 %1106, %v466_v6  }
  0x87   :  { %v364_v12 = vadd.f32 %v242_v7, %v189_v9 }
  0x88   :  { %v247_v13 = vpop.permute.xlu1 %246  ;;  %v66_v14 = vpop.permute.xlu0 %65 }
  0x89   :  { %v190_v15 = vmul.f32 %v1524_v4, %v66_v14  ;;  %564 = vperm.xlu1 %1107, %v469_v10   ;;  %559 = vperm.xlu0 %1106, %v468_v11   ;;  %1146 = vtanh.f32 %v364_v12 }
  0x8b   :  { %v365_v18 = vadd.f32 %v247_v13, %v190_v15 }
  0x8c   :  { %v76_v19 = vpop.permute.xlu1 %75  ;;  %v71_v20 = vpop.permute.xlu0 %70 }
  0x8d   :  { %1148 = vtanh.f32 %v365_v18  ;;  %574 = vperm.xlu1 %1107, %v471_v16   ;;  %569 = vperm.xlu0 %1106, %v470_v17   ;;  %v192_v23 = vmul.f32 %v1524_v4, %v76_v19  ;;  %v191_v24 = vmul.f32 %v1524_v4, %v71_v20 }
  0x90   :  { %v257_v25 = vpop.permute.xlu1 %256  ;;  %v252_v26 = vpop.permute.xlu0 %251 }
  0x91   :  { %v367_v27 = vadd.f32 %v257_v25, %v192_v23  ;;  %v366_v28 = vadd.f32 %v252_v26, %v191_v24  ;;  %584 = vperm.xlu1 %1107, %v473_v21   ;;  %579 = vperm.xlu0 %1106, %v472_v22  }
  0x93   :  { %1150 = vtanh.f32 %v367_v27  ;;  %v1147_v33 = vpop.eup %1146 }
  0x94   :  { %1152 = vtanh.f32 %v366_v28  ;;  %v86_v31 = vpop.permute.xlu1 %85  ;;  %v81_v32 = vpop.permute.xlu0 %80 }
  0x95   :  { %594 = vperm.xlu1 %1107, %v475_v29   ;;  %589 = vperm.xlu0 %1106, %v474_v30   ;;  %v194_v37 = vmul.f32 %v1524_v4, %v86_v31  ;;  %v193_v38 = vmul.f32 %v1524_v4, %v81_v32 }
  0x97   :  { %v1149_v36 = vpop.eup %1148 }
  0x98   :  { %v267_v39 = vpop.permute.xlu1 %266  ;;  %v262_v40 = vpop.permute.xlu0 %261  ;;  %v414_v41 = vpack.c.bf16 %v1149_v36, %v1147_v33 }
  0x99   :  { %v369_v42 = vadd.f32 %v267_v39, %v194_v37  ;;  %v368_v43 = vadd.f32 %v262_v40, %v193_v38  ;;  %938 = vperm.xlu1 %1107, %v935_v34   ;;  %599 = vperm.xlu0 %1106, %v476_v35  }
  0x9a   :  { %761 = vmatpush1.bf16.msra.mxu0 %v414_v41 }
  0x9b   :  { %1154 = vtanh.f32 %v369_v42  ;;  %762 = vmatprep.subr.bf16.mxu0 %v1270_v3 }
  0x9c   :  { %1156 = vtanh.f32 %v368_v43  ;;  %v96_v44 = vpop.permute.xlu1 %95  ;;  %v91_v45 = vpop.permute.xlu0 %90 }
  0x9d   :  { %v1151_v46 = vpop.eup %1150  ;;  %v196_v48 = vmul.f32 %v1524_v4, %v96_v44  ;;  %v195_v49 = vmul.f32 %v1524_v4, %v91_v45 }
  0x9e   :  { %v1153_v47 = vpop.eup %1152 }
  0x9f   :  { %v415_v50 = vpack.c.bf16 %v1151_v46, %v1153_v47 }
  0xa0   :  { %v277_v51 = vpop.permute.xlu1 %276  ;;  %v272_v52 = vpop.permute.xlu0 %271 }
  0xa1   :  { %v371_v53 = vadd.f32 %v277_v51, %v196_v48  ;;  %v370_v54 = vadd.f32 %v272_v52, %v195_v49  ;;  %763 = vmatpush1.bf16.msra.mxu0 %v415_v50 }
  0xa2   :  { %764 = vmatprep.subr.bf16.mxu0 %v1270_v3 }
  0xa3   :  { %1158 = vtanh.f32 %v371_v53 }
  0xa4   :  { %1160 = vtanh.f32 %v370_v54  ;;  %v106_v55 = vpop.permute.xlu1 %105  ;;  %v101_v56 = vpop.permute.xlu0 %100 }
  0xa5   :  { %v1155_v57 = vpop.eup %1154  ;;  %v198_v59 = vmul.f32 %v1524_v4, %v106_v55  ;;  %v197_v60 = vmul.f32 %v1524_v4, %v101_v56 }
  0xa6   :  { %v1157_v58 = vpop.eup %1156 }
  0xa7   :  { %v416_v61 = vpack.c.bf16 %v1155_v57, %v1157_v58 }
  0xa8   :  { %v287_v62 = vpop.permute.xlu1 %286  ;;  %v282_v63 = vpop.permute.xlu0 %281 }
  0xa9   :  { %v373_v0 = vadd.f32 %v287_v62, %v198_v59  ;;  %v372_v1 = vadd.f32 %v282_v63, %v197_v60  ;;  %765 = vmatpush1.bf16.msra.mxu0 %v416_v61 }
  0xaa   :  { %766 = vmatprep.subr.bf16.mxu0 %v1270_v3 }
  0xab   :  { %1162 = vtanh.f32 %v373_v0 }
  0xac   :  { %1164 = vtanh.f32 %v372_v1  ;;  %v116_v2 = vpop.permute.xlu1 %115  ;;  %v111_v5 = vpop.permute.xlu0 %110 }
  0xad   :  { %v1159_v6 = vpop.eup %1158  ;;  %v200_v8 = vmul.f32 %v1524_v4, %v116_v2  ;;  %v199_v9 = vmul.f32 %v1524_v4, %v111_v5 }
  0xae   :  { %v1161_v7 = vpop.eup %1160 }
  0xaf   :  { %v417_v10 = vpack.c.bf16 %v1159_v6, %v1161_v7 }
  0xb0   :  { %v297_v11 = vpop.permute.xlu1 %296  ;;  %v292_v12 = vpop.permute.xlu0 %291 }
  0xb1   :  { %v375_v13 = vadd.f32 %v297_v11, %v200_v8  ;;  %v374_v14 = vadd.f32 %v292_v12, %v199_v9  ;;  %767 = vmatpush1.bf16.msra.mxu0 %v417_v10 }
  0xb2   :  { %768 = vmatprep.subr.bf16.mxu0 %v1270_v3 }
  0xb3   :  { %1166 = vtanh.f32 %v375_v13 }
  0xb4   :  { %1168 = vtanh.f32 %v374_v14  ;;  %v126_v15 = vpop.permute.xlu1 %125  ;;  %v121_v16 = vpop.permute.xlu0 %120 }
  0xb5   :  { %v1163_v17 = vpop.eup %1162  ;;  %v202_v19 = vmul.f32 %v1524_v4, %v126_v15  ;;  %v201_v20 = vmul.f32 %v1524_v4, %v121_v16 }
  0xb6   :  { %v1165_v18 = vpop.eup %1164 }
  0xb7   :  { %v418_v21 = vpack.c.bf16 %v1163_v17, %v1165_v18 }
  0xb8   :  { %v307_v22 = vpop.permute.xlu1 %306  ;;  %v302_v23 = vpop.permute.xlu0 %301 }
  0xb9   :  { %v377_v24 = vadd.f32 %v307_v22, %v202_v19  ;;  %v376_v25 = vadd.f32 %v302_v23, %v201_v20  ;;  %769 = vmatpush1.bf16.msra.mxu0 %v418_v21 }
  0xba   :  { %770 = vmatprep.subr.bf16.mxu0 %v1270_v3 }
  0xbb   :  { %1170 = vtanh.f32 %v377_v24 }
  0xbc   :  { %1172 = vtanh.f32 %v376_v25  ;;  %v136_v26 = vpop.permute.xlu1 %135  ;;  %v131_v27 = vpop.permute.xlu0 %130 }
  0xbd   :  { %v1167_v28 = vpop.eup %1166  ;;  %v204_v30 = vmul.f32 %v1524_v4, %v136_v26  ;;  %v203_v31 = vmul.f32 %v1524_v4, %v131_v27 }
  0xbe   :  { %v1169_v29 = vpop.eup %1168 }
  0xbf   :  { %v419_v32 = vpack.c.bf16 %v1167_v28, %v1169_v29 }
  0xc0   :  { %v317_v33 = vpop.permute.xlu1 %316  ;;  %v312_v34 = vpop.permute.xlu0 %311 }
  0xc1   :  { %v379_v35 = vadd.f32 %v317_v33, %v204_v30  ;;  %v378_v36 = vadd.f32 %v312_v34, %v203_v31  ;;  %771 = vmatpush1.bf16.msra.mxu0 %v419_v32  ;;  %v1111_v32 = vld [vmem:[%s1736_s4 + $0x14] ss:$8 sps:$4 sm:$0xff]   ;;  %v1113_v33 = vld [vmem:[%s1736_s4 + $0x10] ss:$8 sps:$4 sm:$0xff]   ;;  %v1114_v34 = vld [vmem:[%s1736_s4 + $0x24] ss:$8 sps:$4 sm:$0xff]  }
  0xc2   :  { %772 = vmatprep.subr.bf16.mxu0 %v1270_v3 }
  0xc3   :  { %1174 = vtanh.f32 %v379_v35  ;;  %v1116_v35 = vld [vmem:[%s1736_s4 + $0x20] ss:$8 sps:$4 sm:$0xff]  }
  0xc4   :  { %1176 = vtanh.f32 %v378_v36  ;;  %v146_v37 = vpop.permute.xlu1 %145  ;;  %v141_v38 = vpop.permute.xlu0 %140  ;;  %v1117_v36 = vld [vmem:[%s1736_s4 + $0x34] ss:$8 sps:$4 sm:$0xff]  }
  0xc5   :  { %v1171_v39 = vpop.eup %1170  ;;  %v206_v41 = vmul.f32 %v1524_v4, %v146_v37  ;;  %v205_v42 = vmul.f32 %v1524_v4, %v141_v38  ;;  %v1119_v37 = vld [vmem:[%s1736_s4 + $0x30] ss:$8 sps:$4 sm:$0xff]   ;;  %v1120_v38 = vld [vmem:[%s1736_s4 + $0x44] ss:$8 sps:$4 sm:$0xff]  }
  0xc6   :  { %v1173_v40 = vpop.eup %1172 }
  0xc7   :  { %v420_v43 = vpack.c.bf16 %v1171_v39, %v1173_v40  ;;  %v1122_v39 = vld [vmem:[%s1736_s4 + $0x40] ss:$8 sps:$4 sm:$0xff]   ;;  %v1123_v40 = vld [vmem:[%s1736_s4 + $0x54] ss:$8 sps:$4 sm:$0xff]  }
  0xc8   :  { %v327_v44 = vpop.permute.xlu1 %326  ;;  %v322_v45 = vpop.permute.xlu0 %321 }
  0xc9   :  { %v381_v46 = vadd.f32 %v327_v44, %v206_v41  ;;  %v380_v47 = vadd.f32 %v322_v45, %v205_v42  ;;  %773 = vmatpush1.bf16.msra.mxu0 %v420_v43  ;;  %v1125_v41 = vld [vmem:[%s1736_s4 + $0x50] ss:$8 sps:$4 sm:$0xff]   ;;  %v1126_v42 = vld [vmem:[%s1736_s4 + $0x64] ss:$8 sps:$4 sm:$0xff]   ;;  %v1128_v43 = vld [vmem:[%s1736_s4 + $0x60] ss:$8 sps:$4 sm:$0xff]  }
  0xca   :  { %774 = vmatprep.subr.bf16.mxu0 %v1270_v3  ;;  %v1129_v44 = vld [vmem:[%s1736_s4 + $0x74] ss:$8 sps:$4 sm:$0xff]   ;;  %v1131_v45 = vld [vmem:[%s1736_s4 + $0x70] ss:$8 sps:$4 sm:$0xff]  }
  0xcb   :  { %1178 = vtanh.f32 %v381_v46  ;;  %v1132_v46 = vld [vmem:[%s1736_s4 + $0x84] ss:$8 sps:$4 sm:$0xff]  }
  0xcc   :  { %1180 = vtanh.f32 %v380_v47  ;;  %v156_v48 = vpop.permute.xlu1 %155  ;;  %v151_v49 = vpop.permute.xlu0 %150  ;;  %v1134_v47 = vld [vmem:[%s1736_s4 + $0x80] ss:$8 sps:$4 sm:$0xff]  }
  0xcd   :  { %v1175_v50 = vpop.eup %1174  ;;  %v208_v52 = vmul.f32 %v1524_v4, %v156_v48  ;;  %v207_v53 = vmul.f32 %v1524_v4, %v151_v49  ;;  %v1135_v48 = vld [vmem:[%s1736_s4 + $0x94] ss:$8 sps:$4 sm:$0xff]   ;;  %v1137_v49 = vld [vmem:[%s1736_s4 + $0x90] ss:$8 sps:$4 sm:$0xff]  }
  0xce   :  { %v1177_v51 = vpop.eup %1176 }
  0xcf   :  { %v421_v54 = vpack.c.bf16 %v1175_v50, %v1177_v51  ;;  %v1138_v50 = vld [vmem:[%s1736_s4 + $0xa4] ss:$8 sps:$4 sm:$0xff]   ;;  %v1140_v51 = vld [vmem:[%s1736_s4 + $0xa0] ss:$8 sps:$4 sm:$0xff]  }
  0xd0   :  { %v337_v55 = vpop.permute.xlu1 %336  ;;  %v332_v56 = vpop.permute.xlu0 %331 }
  0xd1   :  { %v383_v57 = vadd.f32 %v337_v55, %v208_v52  ;;  %v382_v58 = vadd.f32 %v332_v56, %v207_v53  ;;  %775 = vmatpush1.bf16.msra.mxu0 %v421_v54  ;;  %v1141_v52 = vld [vmem:[%s1736_s4 + $0xb4] ss:$8 sps:$4 sm:$0xff]   ;;  %v451_v53 = vld [vmem:[%s1736_s4 + $0xc0] sm:$0xff]  ;;  %v1143_v54 = vld [vmem:[%s1736_s4 + $0xb0] ss:$8 sps:$4 sm:$0xff]  }
  0xd2   :  { %776 = vmatprep.subr.bf16.mxu0 %v1270_v3  ;;  %v1087_v55 = vcombine.high %v451_v53, %v451_v53  ;;  %v1086_v56 = vcombine.low %v451_v53, %v451_v53 }
  0xd3   :  { %1182 = vtanh.f32 %v383_v57  ;;  %v941_v57 = vlaneseq }
  0xd4   :  { %1184 = vtanh.f32 %v382_v58  ;;  %v166_v59 = vpop.permute.xlu1 %165  ;;  %v161_v60 = vpop.permute.xlu0 %160  ;;  %v1271_v58 = vmov 1966171168  }
  0xd5   :  { %v1179_v61 = vpop.eup %1178  ;;  %v210_v63 = vmul.f32 %v1524_v4, %v166_v59  ;;  %v209_v0 = vmul.f32 %v1524_v4, %v161_v60  ;;  %v955_v59 = vunpack.c.l.s4 %v1271_v58  ;;  %v1682_v60 = vshrl.u32 %v941_v57, 7 }
  0xd6   :  { %v1181_v62 = vpop.eup %1180 }
  0xd7   :  { %v422_v1 = vpack.c.bf16 %v1179_v61, %v1181_v62  ;;  %v956_v61 = vunpack.c.0.s8 %v955_v59  ;;  %v1687_v62 = vld.sshfl [vmem:[%s1738_s6] sm:$0x11 pattern:$0x75316420] }
  0xd8   :  { %v347_v2 = vpop.permute.xlu1 %346  ;;  %v342_v5 = vpop.permute.xlu0 %341 }
  0xd9   :  { %v385_v6 = vadd.f32 %v347_v2, %v210_v63  ;;  %v384_v7 = vadd.f32 %v342_v5, %v209_v0  ;;  %777 = vmatpush1.bf16.msra.mxu0 %v422_v1  ;;  %v953_v63 = vcombine.high %v1687_v62, %v1687_v62  ;;  %v1692_v0 = vsub.s32 %v956_v61, %v1682_v60 }
  0xda   :  { %778 = vmatprep.subr.bf16.mxu0 %v1270_v3 }
  0xdb   :  { %1186 = vtanh.f32 %v385_v6  ;;  %v967_v1 = vrot.slane %v953_v63, %v1692_v0  ;;  %v960_v2 = vrot.slane %v1687_v62, %v1692_v0 }
  0xdc   :  { %1188 = vtanh.f32 %v384_v7  ;;  %v176_v8 = vpop.permute.xlu1 %175  ;;  %v171_v9 = vpop.permute.xlu0 %170 }
  0xdd   :  { %v1183_v10 = vpop.eup %1182  ;;  %v212_v12 = vmul.f32 %v1524_v4, %v176_v8  ;;  %v211_v13 = vmul.f32 %v1524_v4, %v171_v9  ;;  %1102 = vmatprep.mubr.msk.bf16.mxu1 %vm716_vm0, %v967_v1 }
  0xde   :  { %v1185_v11 = vpop.eup %1184 }
  0xdf   :  { %v423_v14 = vpack.c.bf16 %v1183_v10, %v1185_v11 }
  0xe0   :  { %v357_v15 = vpop.permute.xlu1 %356  ;;  %v352_v16 = vpop.permute.xlu0 %351 }
  0xe1   :  { %v387_v17 = vadd.f32 %v357_v15, %v212_v12  ;;  %v386_v18 = vadd.f32 %v352_v16, %v211_v13  ;;  %779 = vmatpush1.bf16.msra.mxu0 %v423_v14 }
  0xe2   :  { %780 = vmatprep.subr.bf16.mxu0 %v1270_v3 }
  0xe3   :  { %1190 = vtanh.f32 %v387_v17 }
  0xe4   :  { %1192 = vtanh.f32 %v386_v18  ;;  %v181_v19 = vpop.permute.xlu0 %180  ;;  %v362_v23 = vpop.permute.xlu1 %361 }
  0xe5   :  { %v1187_v20 = vpop.eup %1186  ;;  %v213_v21 = vmul.f32 %v1524_v4, %v181_v19  ;;  %v1108_v4 = vld [vmem:[%s1736_s4] ss:$8 sps:$4 sm:$0xff]  }
  0xe6   :  { %v1189_v22 = vpop.eup %1188 }
  0xe7   :  { %v388_v24 = vadd.f32 %v362_v23, %v213_v21  ;;  %v424_v25 = vpack.c.bf16 %v1187_v20, %v1189_v22 }
  0xe8   :  { %v480_v5 = vpop.permute.xlu0 %479  ;;  %v485_v9 = vpop.permute.xlu1 %484 }
  0xe9   :  { %1194 = vtanh.f32 %v388_v24  ;;  %781 = vmatpush1.bf16.msra.mxu0 %v424_v25 }
  0xea   :  { %782 = vmatprep.subr.bf16.mxu0 %v1270_v3 }
  0xec   :  { %v490_v13 = vpop.permute.xlu0 %489  ;;  %v495_v17 = vpop.permute.xlu1 %494 }
  0xed   :  { %v1191_v26 = vpop.eup %1190 }
  0xee   :  { %v1193_v27 = vpop.eup %1192 }
  0xef   :  { %v425_v28 = vpack.c.bf16 %v1191_v26, %v1193_v27 }
  0xf0   :  { %v500_v23 = vpop.permute.xlu0 %499 }
  0xf1   :  { %783 = vmatpush1.bf16.msra.mxu0 %v425_v28  ;;  %v505_v28 = vpop.permute.xlu1 %504 }
  0xf2   :  { %784 = vmatprep.subr.bf16.mxu0 %v1270_v3 }
  0xf3   :  { %v1195_v29 = vpop.eup %1194 }
  0xf4   :  { %v426_v30 = vpack.c.bf16 %v1195_v29, %v1195_v29 }
  0xf6   :  { %v758_v31 = vsel %vm756_vm1, %v426_v30, 0 }
  0xf7   :  { %785 = vmatpush1.bf16.msra.mxu0 %v758_v31 }
  0xfa   :  { %793 = vmatmul.mubr.bf16.vlgmr.msra.gmra.mrb[0].mxu0 %v1108_v4 }
  0xfb   :  { %1089 = vmatprep.mubr.msk.bf16.mxu0 %vm716_vm0, %v1111_v32 }
 0x102   :  { %801 = vmatmul.mubr.bf16.gmra.mrb[4].mxu0 %v1113_v33  ;;  %v510_v33 = vpop.permute.xlu0 %509 }
 0x103   :  { %1090 = vmatprep.mubr.msk.bf16.mxu0 %vm716_vm0, %v1114_v34 }
 0x10a   :  { %809 = vmatmul.mubr.bf16.gmra.mrb[8].mxu0 %v1116_v35 }
 0x10b   :  { %1091 = vmatprep.mubr.msk.bf16.mxu0 %vm716_vm0, %v1117_v36 }
 0x112   :  { %817 = vmatmul.mubr.bf16.gmra.mrb[12].mxu0 %v1119_v37 }
 0x113   :  { %1092 = vmatprep.mubr.msk.bf16.mxu0 %vm716_vm0, %v1120_v38  ;;  %v515_v38 = vpop.permute.xlu1 %514 }
 0x11a   :  { %825 = vmatmul.mubr.bf16.gmra.mrb[16].mxu0 %v1122_v39 }
 0x11b   :  { %1093 = vmatprep.mubr.msk.bf16.mxu0 %vm716_vm0, %v1123_v40 }
 0x122   :  { %833 = vmatmul.mubr.bf16.gmra.mrb[20].mxu0 %v1125_v41 }
 0x123   :  { %1094 = vmatprep.mubr.msk.bf16.mxu0 %vm716_vm0, %v1126_v42 }
 0x12a   :  { %841 = vmatmul.mubr.bf16.gmra.mrb[24].mxu0 %v1128_v43 }
 0x12b   :  { %1095 = vmatprep.mubr.msk.bf16.mxu0 %vm716_vm0, %v1129_v44  ;;  %v520_v44 = vpop.permute.xlu0 %519 }
 0x132   :  { %849 = vmatmul.mubr.bf16.gmra.mrb[28].mxu0 %v1131_v45 }
 0x133   :  { %1096 = vmatprep.mubr.msk.bf16.mxu0 %vm716_vm0, %v1132_v46 }
 0x13a   :  { %857 = vmatmul.mubr.bf16.gmra.mrb[32].mxu0 %v1134_v47 }
 0x13b   :  { %1097 = vmatprep.mubr.msk.bf16.mxu0 %vm716_vm0, %v1135_v48 }
 0x142   :  { %865 = vmatmul.mubr.bf16.gmra.mrb[36].mxu0 %v1137_v49  ;;  %v525_v49 = vpop.permute.xlu1 %524 }
 0x143   :  { %1098 = vmatprep.mubr.msk.bf16.mxu0 %vm716_vm0, %v1138_v50 }
 0x146   :  { %v535_v63 = vpop.permute.xlu1 %534 }
 0x14a   :  { %873 = vmatmul.mubr.bf16.gmra.mrb[40].mxu0 %v1140_v51 }
 0x14b   :  { %1099 = vmatprep.mubr.msk.bf16.mxu0 %vm716_vm0, %v1141_v52 }
 0x152   :  { %881 = vmatmul.mubr.bf16.gmra.mrb[44].mxu0 %v1143_v54 }
 0x153   :  { %1100 = vmatprep.mubr.msk.bf16.mxu0 %vm716_vm0, %v1087_v55  ;;  %v530_v55 = vpop.permute.xlu0 %529 }
 0x15a   :  { %889 = vmatmul.mubr.bf16.gmra.mrb[48].mxu0 %v1086_v56 }
 0x1cd   :  { %v794_v6 = vpop.f32.mrb[0].mxu0 }
 0x1ce   :  { %v795_v7 = vadd.f32 %v794_v6, %v480_v5  ;;  %v796_v8 = vpop.f32.mrb[1].mxu0 }
 0x1cf   :  { %v797_v10 = vpop.f32.mrb[2].mxu0 }
 0x1d0   :  { %v798_v11 = vadd.f32 %v797_v10, %v485_v9  ;;  %v799_v12 = vpop.f32.mrb[3].mxu0  ;;  %1196 = vtanh.f32 %v795_v7  ;;  %v540_v9 = vpop.permute.xlu0 %539 }
 0x1d2   :  { %1198 = vtanh.f32 %v798_v11 }
 0x1d5   :  { %v802_v14 = vpop.f32.mrb[4].mxu0 }
 0x1d6   :  { %v803_v15 = vadd.f32 %v802_v14, %v490_v13  ;;  %v804_v16 = vpop.f32.mrb[5].mxu0  ;;  %v545_v14 = vpop.permute.xlu1 %544 }
 0x1d7   :  { %v805_v18 = vpop.f32.mrb[6].mxu0 }
 0x1d8   :  { %v806_v19 = vadd.f32 %v805_v18, %v495_v17  ;;  %v807_v20 = vpop.f32.mrb[7].mxu0  ;;  %1200 = vtanh.f32 %v803_v15 }
 0x1d9   :  { %v550_v20 = vpop.permute.xlu0 %549 }
 0x1da   :  { %1202 = vtanh.f32 %v806_v19  ;;  %v1197_v21 = vpop.eup %1196 }
 0x1dc   :  { %v1199_v22 = vpop.eup %1198 }
 0x1dd   :  { %v810_v24 = vpop.f32.mrb[8].mxu0  ;;  %v921_v25 = vpack.c.bf16 %v1199_v22, %v1197_v21 }
 0x1de   :  { %v811_v26 = vadd.f32 %v810_v24, %v500_v23  ;;  %v812_v27 = vpop.f32.mrb[9].mxu0 }
 0x1df   :  { %v813_v29 = vpop.f32.mrb[10].mxu0  ;;  %976 = vmatpush1.bf16.msra.mxu1 %v921_v25  ;;  %v555_v25 = vpop.permute.xlu1 %554 }
 0x1e0   :  { %v814_v30 = vadd.f32 %v813_v29, %v505_v28  ;;  %v815_v31 = vpop.f32.mrb[11].mxu0  ;;  %977 = vmatprep.subr.bf16.mxu1 %v1270_v3  ;;  %1204 = vtanh.f32 %v811_v26 }
 0x1e1   :  { %v560_v31 = vpop.permute.xlu0 %559 }
 0x1e2   :  { %1206 = vtanh.f32 %v814_v30  ;;  %v1201_v4 = vpop.eup %1200 }
 0x1e4   :  { %v1203_v32 = vpop.eup %1202 }
 0x1e5   :  { %v818_v34 = vpop.f32.mrb[12].mxu0  ;;  %v922_v35 = vpack.c.bf16 %v1203_v32, %v1201_v4 }
 0x1e6   :  { %v819_v36 = vadd.f32 %v818_v34, %v510_v33  ;;  %v820_v37 = vpop.f32.mrb[13].mxu0 }
 0x1e7   :  { %v821_v39 = vpop.f32.mrb[14].mxu0  ;;  %978 = vmatpush1.bf16.msra.mxu1 %v922_v35  ;;  %v565_v35 = vpop.permute.xlu1 %564 }
 0x1e8   :  { %v822_v40 = vadd.f32 %v821_v39, %v515_v38  ;;  %v823_v41 = vpop.f32.mrb[15].mxu0  ;;  %979 = vmatprep.subr.bf16.mxu1 %v1270_v3  ;;  %1208 = vtanh.f32 %v819_v36 }
 0x1e9   :  { %v570_v41 = vpop.permute.xlu0 %569 }
 0x1ea   :  { %1210 = vtanh.f32 %v822_v40  ;;  %v1205_v42 = vpop.eup %1204 }
 0x1ec   :  { %v1207_v43 = vpop.eup %1206 }
 0x1ed   :  { %v826_v45 = vpop.f32.mrb[16].mxu0  ;;  %v923_v46 = vpack.c.bf16 %v1207_v43, %v1205_v42 }
 0x1ee   :  { %v827_v47 = vadd.f32 %v826_v45, %v520_v44  ;;  %v828_v48 = vpop.f32.mrb[17].mxu0 }
 0x1ef   :  { %v829_v50 = vpop.f32.mrb[18].mxu0  ;;  %980 = vmatpush1.bf16.msra.mxu1 %v923_v46  ;;  %v575_v46 = vpop.permute.xlu1 %574 }
 0x1f0   :  { %v830_v51 = vadd.f32 %v829_v50, %v525_v49  ;;  %v831_v52 = vpop.f32.mrb[19].mxu0  ;;  %981 = vmatprep.subr.bf16.mxu1 %v1270_v3  ;;  %1212 = vtanh.f32 %v827_v47 }
 0x1f1   :  { %v580_v52 = vpop.permute.xlu0 %579 }
 0x1f2   :  { %1214 = vtanh.f32 %v830_v51  ;;  %v1209_v53 = vpop.eup %1208 }
 0x1f4   :  { %v1211_v54 = vpop.eup %1210 }
 0x1f5   :  { %v834_v56 = vpop.f32.mrb[20].mxu0  ;;  %v924_v58 = vpack.c.bf16 %v1211_v54, %v1209_v53 }
 0x1f6   :  { %v835_v59 = vadd.f32 %v834_v56, %v530_v55  ;;  %v836_v61 = vpop.f32.mrb[21].mxu0 }
 0x1f7   :  { %v837_v1 = vpop.f32.mrb[22].mxu0  ;;  %982 = vmatpush1.bf16.msra.mxu1 %v924_v58  ;;  %v585_v58 = vpop.permute.xlu1 %584 }
 0x1f8   :  { %v838_v5 = vadd.f32 %v837_v1, %v535_v63  ;;  %v839_v6 = vpop.f32.mrb[23].mxu0  ;;  %983 = vmatprep.subr.bf16.mxu1 %v1270_v3  ;;  %1216 = vtanh.f32 %v835_v59 }
 0x1f9   :  { %v590_v6 = vpop.permute.xlu0 %589 }
 0x1fa   :  { %1218 = vtanh.f32 %v838_v5  ;;  %v1213_v7 = vpop.eup %1212 }
 0x1fc   :  { %v1215_v8 = vpop.eup %1214 }
 0x1fd   :  { %v842_v10 = vpop.f32.mrb[24].mxu0  ;;  %v925_v11 = vpack.c.bf16 %v1215_v8, %v1213_v7 }
 0x1fe   :  { %v843_v12 = vadd.f32 %v842_v10, %v540_v9  ;;  %v844_v13 = vpop.f32.mrb[25].mxu0 }
 0x1ff   :  { %v845_v15 = vpop.f32.mrb[26].mxu0  ;;  %984 = vmatpush1.bf16.msra.mxu1 %v925_v11  ;;  %v595_v11 = vpop.permute.xlu1 %594 }
 0x200   :  { %v846_v16 = vadd.f32 %v845_v15, %v545_v14  ;;  %v847_v17 = vpop.f32.mrb[27].mxu0  ;;  %985 = vmatprep.subr.bf16.mxu1 %v1270_v3  ;;  %1220 = vtanh.f32 %v843_v12 }
 0x201   :  { %v600_v17 = vpop.permute.xlu0 %599 }
 0x202   :  { %1222 = vtanh.f32 %v846_v16  ;;  %v1217_v18 = vpop.eup %1216 }
 0x204   :  { %v1219_v19 = vpop.eup %1218 }
 0x205   :  { %v850_v21 = vpop.f32.mrb[28].mxu0  ;;  %v926_v22 = vpack.c.bf16 %v1219_v19, %v1217_v18 }
 0x206   :  { %v851_v23 = vadd.f32 %v850_v21, %v550_v20  ;;  %v852_v24 = vpop.f32.mrb[29].mxu0 }
 0x207   :  { %v853_v26 = vpop.f32.mrb[30].mxu0  ;;  %986 = vmatpush1.bf16.msra.mxu1 %v926_v22 }
 0x208   :  { %v854_v27 = vadd.f32 %v853_v26, %v555_v25  ;;  %v855_v28 = vpop.f32.mrb[31].mxu0  ;;  %987 = vmatprep.subr.bf16.mxu1 %v1270_v3  ;;  %1224 = vtanh.f32 %v851_v23 }
 0x20a   :  { %1226 = vtanh.f32 %v854_v27  ;;  %v1221_v29 = vpop.eup %1220 }
 0x20c   :  { %v1223_v30 = vpop.eup %1222 }
 0x20d   :  { %v858_v4 = vpop.f32.mrb[32].mxu0  ;;  %v927_v32 = vpack.c.bf16 %v1223_v30, %v1221_v29  ;;  %v1016_v30 = vand.u32 127, %v941_v57 }
 0x20e   :  { %v859_v33 = vadd.f32 %v858_v4, %v560_v31  ;;  %v860_v34 = vpop.f32.mrb[33].mxu0  ;;  %v1025_v4 = vstv %s1024_s13 }
 0x20f   :  { %v861_v36 = vpop.f32.mrb[34].mxu0  ;;  %988 = vmatpush1.bf16.msra.mxu1 %v927_v32  ;;  %v1022_v31 = vadd.s32 %v1016_v30, %v1682_v60 }
 0x210   :  { %v862_v37 = vadd.f32 %v861_v36, %v565_v35  ;;  %v863_v38 = vpop.f32.mrb[35].mxu0  ;;  %989 = vmatprep.subr.bf16.mxu1 %v1270_v3  ;;  %1228 = vtanh.f32 %v859_v33 }
 0x211   :  { %v1026_v32 = vadd.s32 %v1025_v4, %v1022_v31 }
 0x212   :  { %1230 = vtanh.f32 %v862_v37  ;;  %v1225_v39 = vpop.eup %1224 }
 0x214   :  { %v1227_v40 = vpop.eup %1226 }
 0x215   :  { %v866_v42 = vpop.f32.mrb[36].mxu0  ;;  %v928_v43 = vpack.c.bf16 %v1227_v40, %v1225_v39 }
 0x216   :  { %v867_v44 = vadd.f32 %v866_v42, %v570_v41  ;;  %v868_v45 = vpop.f32.mrb[37].mxu0 }
 0x217   :  { %v869_v47 = vpop.f32.mrb[38].mxu0  ;;  %990 = vmatpush1.bf16.msra.mxu1 %v928_v43  ;;  %v943_v43 = vsub.s32 0, %v1682_v60 }
 0x218   :  { %v870_v48 = vadd.f32 %v869_v47, %v575_v46  ;;  %v871_v49 = vpop.f32.mrb[39].mxu0  ;;  %991 = vmatprep.subr.bf16.mxu1 %v1270_v3  ;;  %1232 = vtanh.f32 %v867_v44  ;;  %v939_v44 = vpop.permute.xlu1 %938 }
 0x219   :  { %v944_v46 = vrot.slane %v939_v44, %v943_v43 }
 0x21a   :  { %1234 = vtanh.f32 %v870_v48  ;;  %v1229_v50 = vpop.eup %1228 }
 0x21c   :  { %v1231_v51 = vpop.eup %1230 }
 0x21d   :  { %v874_v53 = vpop.f32.mrb[40].mxu0  ;;  %v929_v54 = vpack.c.bf16 %v1231_v51, %v1229_v50 }
 0x21e   :  { %v875_v55 = vadd.f32 %v874_v53, %v580_v52  ;;  %v876_v56 = vpop.f32.mrb[41].mxu0 }
 0x21f   :  { %v877_v59 = vpop.f32.mrb[42].mxu0  ;;  %992 = vmatpush1.bf16.msra.mxu1 %v929_v54 }
 0x220   :  { %v878_v61 = vadd.f32 %v877_v59, %v585_v58  ;;  %v879_v63 = vpop.f32.mrb[43].mxu0  ;;  %993 = vmatprep.subr.bf16.mxu1 %v1270_v3  ;;  %1236 = vtanh.f32 %v875_v55 }
 0x222   :  { %1238 = vtanh.f32 %v878_v61  ;;  %v1233_v1 = vpop.eup %1232 }
 0x224   :  { %v1235_v5 = vpop.eup %1234 }
 0x225   :  { %v882_v7 = vpop.f32.mrb[44].mxu0  ;;  %v930_v8 = vpack.c.bf16 %v1235_v5, %v1233_v1 }
 0x226   :  { %v883_v9 = vadd.f32 %v882_v7, %v590_v6  ;;  %v884_v10 = vpop.f32.mrb[45].mxu0 }
 0x227   :  { %v885_v12 = vpop.f32.mrb[46].mxu0  ;;  %994 = vmatpush1.bf16.msra.mxu1 %v930_v8 }
 0x228   :  { %v886_v13 = vadd.f32 %v885_v12, %v595_v11  ;;  %v887_v14 = vpop.f32.mrb[47].mxu0  ;;  %995 = vmatprep.subr.bf16.mxu1 %v1270_v3  ;;  %1240 = vtanh.f32 %v883_v9 }
 0x22a   :  { %1242 = vtanh.f32 %v886_v13  ;;  %v1237_v15 = vpop.eup %1236 }
 0x22c   :  { %v1239_v16 = vpop.eup %1238 }
 0x22d   :  { %v890_v18 = vpop.f32.mrb[48].mxu0  ;;  %v931_v19 = vpack.c.bf16 %v1239_v16, %v1237_v15 }
 0x22e   :  { %v891_v20 = vadd.f32 %v890_v18, %v600_v17  ;;  %v892_v21 = vpop.f32.mrb[49].mxu0 }
 0x22f   :  { %v893_v22 = vpop.f32.mrb[50].mxu0  ;;  %996 = vmatpush1.bf16.msra.mxu1 %v931_v19 }
 0x230   :  { %1244 = vtanh.f32 %v891_v20  ;;  %v894_v23 = vpop.f32.mrb[51].mxu0  ;;  %997 = vmatprep.subr.bf16.mxu1 %v1270_v3 }
 0x232   :  { %v1241_v24 = vpop.eup %1240 }
 0x234   :  { %v1243_v25 = vpop.eup %1242 }
 0x235   :  { %v932_v26 = vpack.c.bf16 %v1243_v25, %v1241_v24 }
 0x237   :  { %998 = vmatpush1.bf16.msra.mxu1 %v932_v26 }
 0x238   :  { %999 = vmatprep.subr.bf16.mxu1 %v1270_v3  ;;  %v1027_v3 = vshrl.u32 %v1026_v32, 16 }
 0x23a   :  { %v1245_v27 = vpop.eup %1244  ;;  %v1028_v33 = vxor.u32 %v1027_v3, %v1026_v32 }
 0x23b   :  { %v933_v28 = vpack.c.bf16 %v1245_v27, %v1245_v27 }
 0x23c   :  { %v1029_v34 = vmul.u32 2146121005, %v1028_v33 }
 0x23d   :  { %v973_v29 = vsel %vm756_vm1, %v933_v28, 0 }
 0x23e   :  { %1000 = vmatpush1.bf16.msra.mxu1 %v973_v29  ;;  %v1030_v35 = vshrl.u32 %v1029_v34, 15 }
 0x240   :  { %v1031_v36 = vxor.u32 %v1030_v35, %v1029_v34 }
 0x241   :  { %1008 = vmatmul.mubr.bf16.vlgmr.msra.gmra.mrb[0].mxu1 %v960_v2 }
 0x242   :  { %v1032_v37 = vmul.u32 2221713035, %v1031_v36 }
 0x244   :  { %v1033_v38 = vshrl.u32 %v1032_v37, 16 }
 0x246   :  { %v1034_v39 = vxor.u32 %v1033_v38, %v1032_v37 }
 0x248   :  { %v1035_v62 = vshrl.u32 %v1034_v39, 8 }
 0x24a   :  { %v1036_v0 = vshrl.u32 %v1035_v62, 16  ;;  %v1037_v2 = vand.u32 65535, %v1035_v62 }
 0x24c   :  { %v1038_v57 = vcvt.s32.f32 %v1036_v0  ;;  %v1040_v41 = vcvt.s32.f32 %v1037_v2 }
 0x24e   :  { %v1039_v40 = vmul.f32 65536.0, %v1038_v57 }
 0x250   :  { %v1041_v42 = vadd.f32 %v1040_v41, %v1039_v40 }
 0x252   :  { %v1042_v45 = vmul.f32 5.9604645e-08, %v1041_v42 }
 0x254   :  { %vm1043_vm2 = vcmp.ge.f32.partialorder %v1042_v45, 0.5 }
 0x314   :  { %v1009_v47 = vpop.f32.mrb[0].mxu1 }
 0x315   :  { %v1010_v48 = vadd.f32 %v1009_v47, %v944_v46  ;;  %v1011_v49 = vpop.f32.mrb[1].mxu1 }
 0x316   :  { %v1012_v50 = vpop.f32.mrb[2].mxu1 }
 0x317   :  { %v1044_v51 = vmul.f32 2.0, %v1010_v48  ;;  %v1013_v52 = vpop.f32.mrb[3].mxu1 }
 0x319   :  { %v1045_v53 = vsel %vm1043_vm2, %v1044_v51, 0.0 }
 0x31a   :  { %1046 = vst [vmem:[#allocation5] sm:$0x1] %v1045_v53 }
 0x31b   :  { %1257 = shalt.err (!%p1254_p4)
}
 0x31c   :  { %s1258_s18 = scalar_lea.hbm %s1740_s8, 16 }
 0x31d   :  { %p1259_p5 = scmp.ne.s32.totalorder %s1740_s8, %s1258_s18  ;;  %p1262_p6 = scmp.lt.u32.totalorder %s1258_s18, %s1740_s8 }
 0x31f   :  { %p1264_p7 = pnand %p1262_p6, %p1259_p5 }
 0x321   :  { %1267 = shalt.err (!%p1264_p7)
}
 0x322   :  { %1056 = dma.vmem_to_hbm [thread:$0]  %s1054_s14, 16, %s1740_s8, [#allocation6]  }
 0x323   :  { %1268 = dma.done.wait [#allocation6], 16  }
 0x324   :  { %1269 = vsyncadd [#allocation6], 4294967280 }
 0x325   :  { %1060 = vsyncpa [#allocation6], 1 }

</bundles_post_ra>
